<compile_context>
chip_gen: v6e
topology: v6e:2x2x1
jax: 0.10.0
libtpu: 0.0.40
codegen_flags: <defaults>
</compile_context>

<pallas_src>
import functools

import jax
import jax.numpy as jnp
from jax import lax
from jax.experimental import pallas as pl
from jax.experimental.pallas import tpu as pltpu


def _round_up(x, m):
    return (x + m - 1) // m * m


def _choose_tiles(B, S, F, itemsize):
    """Pick (TB, TS) so one x tile is ~<=2 MiB (double-buffered comfortably
    within v7x's 64 MiB / v5e's 16 MiB scoped VMEM)."""
    TB = B if B <= 256 else 256
    target_bytes = 2 * 1024 * 1024
    ts = target_bytes // max(1, TB * F * itemsize)
    if ts >= S:
        TS = S
    else:
        TS = max(8, (ts // 8) * 8)   # sublane-aligned seq tile
    return TB, TS


def _mean_linear_kernel(x_ref, w_ref, b_ref, out_ref, acc_ref, *, inv_s):
    # x_ref:   (TB, TS, F)   input tile (compute dtype)
    # w_ref:   (C_pad, F)    weight, zero-padded rows, resident
    # b_ref:   (1, C_pad)    bias (f32), zero-padded, resident
    # out_ref: (TB, C_pad)   mean-pooled logits (f32)
    # acc_ref: (TB, F)       f32 running sum over the sequence axis
    s = pl.program_id(1)

    @pl.when(s == 0)
    def _init():
        acc_ref[...] = jnp.zeros_like(acc_ref)

    # Sum this sequence tile (f32 accumulation regardless of input dtype).
    acc_ref[...] += jnp.sum(x_ref[...].astype(jnp.float32), axis=1)

    @pl.when(s == pl.num_programs(1) - 1)
    def _finish():
        # Mean over the *original* S (zero-padded positions contribute 0).
        xm = (acc_ref[...] * inv_s).astype(w_ref.dtype)
        # (TB, F) x (C_pad, F) contracting on F -> (TB, C_pad); MXU, f32 acc.
        logits = lax.dot_general(
            xm, w_ref[...],
            dimension_numbers=(((1,), (1,)), ((), ())),
            preferred_element_type=jnp.float32)
        out_ref[...] = logits + b_ref[...]


@functools.partial(jax.jit, static_argnames=("compute_dtype",))
def _logits(x, weight, bias, *, compute_dtype=jnp.float32):
    """Mean-over-seq logits: (B, S, F) -> (B, C) with one Pallas kernel."""
    B, S, F = x.shape
    C = weight.shape[0]
    C_pad = _round_up(C, 128)                       # lane-dense output / MXU N
    itemsize = jnp.dtype(compute_dtype).itemsize
    TB, TS = _choose_tiles(B, S, F, itemsize)
    B_pad = _round_up(B, TB)
    S_pad = _round_up(S, TS)

    x_c = x.astype(compute_dtype)
    if (B_pad, S_pad) != (B, S):
        x_c = jnp.pad(x_c, ((0, B_pad - B), (0, S_pad - S), (0, 0)))

    # Zero-pad weight rows / bias columns to C_pad (padded logits sliced off).
    w_pad = jnp.zeros((C_pad, F), compute_dtype).at[:C].set(
        weight.astype(compute_dtype))
    b_pad = jnp.zeros((1, C_pad), jnp.float32).at[0, :C].set(
        bias.astype(jnp.float32))

    grid = (B_pad // TB, S_pad // TS)
    kernel = functools.partial(_mean_linear_kernel, inv_s=float(1.0 / S))

    out = pl.pallas_call(
        kernel,
        out_shape=jax.ShapeDtypeStruct((B_pad, C_pad), jnp.float32),
        grid_spec=pltpu.PrefetchScalarGridSpec(
            num_scalar_prefetch=0,
            grid=grid,
            in_specs=[
                pl.BlockSpec((TB, TS, F), lambda i, s: (i, s, 0)),   # x tiles
                pl.BlockSpec((C_pad, F), lambda i, s: (0, 0)),       # weight
                pl.BlockSpec((1, C_pad), lambda i, s: (0, 0)),       # bias
            ],
            out_specs=pl.BlockSpec((TB, C_pad), lambda i, s: (i, 0)),
            scratch_shapes=[pltpu.VMEM((TB, F), jnp.float32)],
        ),
        compiler_params=pltpu.CompilerParams(
            dimension_semantics=("parallel", "arbitrary")),
    )(x_c, w_pad, b_pad)

    return out[:B, :C]


def model_forward(x, weight, bias, label=None, compute_dtype=jnp.float32):
    """Mirrors Model.forward: argmax predictions if label is None, otherwise
    the mean cross-entropy loss (glue ops on tiny (B, C) logits)."""
    logits = _logits(x, weight, bias, compute_dtype=compute_dtype)   # (B, C)
    if label is None:
        return jnp.argmax(logits, axis=-1)
    logz = jax.nn.log_softmax(logits, axis=-1)
    nll = -jnp.take_along_axis(logz, label[:, None], axis=-1)[:, 0]
    return jnp.mean(nll)


if __name__ == "__main__":
    # Small deterministic problem: batch=2, seq=8, feature_num=32, class_num=8
    B, S, F, C = 2, 8, 32, 8
    key = jax.random.PRNGKey(0)
    kx, kw, kb, kl = jax.random.split(key, 4)

    x = jax.random.normal(kx, (B, S, F), dtype=jnp.float32)
    # nn.Linear default init: U(-1/sqrt(F), 1/sqrt(F))
    bound = 1.0 / (F ** 0.5)
    weight = jax.random.uniform(kw, (C, F), minval=-bound, maxval=bound,
                                dtype=jnp.float32)
    bias = jax.random.uniform(kb, (C,), minval=-bound, maxval=bound,
                              dtype=jnp.float32)
    label = jax.random.randint(kl, (B,), 0, C, dtype=jnp.int32)

    # Inference path (label=None -> argmax over classes)
    preds = model_forward(x, weight, bias)
    preds = jax.block_until_ready(preds)

    # Training path (label given -> mean cross-entropy loss)
    loss = model_forward(x, weight, bias, label)
    loss = jax.block_until_ready(loss)

    # Reference check in plain JAX (f32 path must match tightly).
    ref_logits = jnp.mean(jnp.einsum("bsf,cf->bsc", x, weight) + bias, axis=1)
    ref_preds = jnp.argmax(ref_logits, axis=-1)
    assert jnp.array_equal(preds, ref_preds), (preds, ref_preds)
    ref_logz = jax.nn.log_softmax(ref_logits, axis=-1)
    ref_loss = jnp.mean(-jnp.take_along_axis(ref_logz, label[:, None], axis=-1))
    assert jnp.allclose(loss, ref_loss, rtol=1e-5, atol=1e-5), (loss, ref_loss)

    # bf16 input / f32 accumulation path (bandwidth-optimized v5e/v6e mode);
    # loose tolerance since inputs are rounded to bf16.
    loss_bf16 = model_forward(x, weight, bias, label,
                              compute_dtype=jnp.bfloat16)
    loss_bf16 = jax.block_until_ready(loss_bf16)
    assert jnp.allclose(loss_bf16, ref_loss, rtol=5e-2, atol=5e-2), (
        loss_bf16, ref_loss)

    print("KERNEL_OK")
</pallas_src>

<mosaic_0001>
module attributes {stable_mosaic.version = 11 : i64} {
  func.func @_mean_linear_kernel(%arg0: i32, %arg1: i32, %arg2: memref<2x8x32xf32, #tpu.memory_space<vmem>>, %arg3: memref<128x32xf32, #tpu.memory_space<vmem>>, %arg4: memref<1x128xf32, #tpu.memory_space<vmem>>, %arg5: memref<2x128xf32, #tpu.memory_space<vmem>>, %arg6: memref<2x32xf32, #tpu.memory_space<vmem>>) attributes {dimension_semantics = [#tpu.dimension_semantics<parallel>, #tpu.dimension_semantics<arbitrary>], iteration_bounds = array<i64: 1, 1>, scalar_prefetch = 0 : i64, scratch_operands = 1 : i64, tpu.core_type = #tpu.core_type<tc>, window_params = [{transform_indices = @transform_0, window_bounds = array<i64: 2, 8, 32>}, {pipeline_mode = #tpu.pipeline_mode<synchronous>, transform_indices = @transform_1, window_bounds = array<i64: 128, 32>}, {pipeline_mode = #tpu.pipeline_mode<synchronous>, transform_indices = @transform_2, window_bounds = array<i64: 1, 128>}, {transform_indices = @transform_3, window_bounds = array<i64: 2, 128>}]} {
    %c0_i32 = arith.constant 0 : i32
    %0 = arith.cmpi eq, %arg1, %c0_i32 : i32
    %1 = arith.extui %0 : i1 to i32
    %c0_i32_0 = arith.constant 0 : i32
    %2 = arith.cmpi ne, %1, %c0_i32_0 : i32
    scf.if %2 {
      %cst_9 = arith.constant 0.000000e+00 : f32
      %11 = vector.broadcast %cst_9 : f32 to vector<2x32xf32>
      %c0_10 = arith.constant 0 : index
      %c0_11 = arith.constant 0 : index
      %12 = vector.load %arg6[%c0_10, %c0_11] : memref<2x32xf32, #tpu.memory_space<vmem>>, vector<2x32xf32>
      tpu.vector_store %arg6[%c0_10, %c0_11], %11 {strides = array<i32>} : memref<2x32xf32, #tpu.memory_space<vmem>>, vector<2x32xf32>,
    } else {
    }
    %c0 = arith.constant 0 : index
    %c0_1 = arith.constant 0 : index
    %3 = vector.load %arg6[%c0, %c0_1] : memref<2x32xf32, #tpu.memory_space<vmem>>, vector<2x32xf32>
    %c0_2 = arith.constant 0 : index
    %c0_3 = arith.constant 0 : index
    %c0_4 = arith.constant 0 : index
    %4 = vector.load %arg2[%c0_2, %c0_3, %c0_4] : memref<2x8x32xf32, #tpu.memory_space<vmem>>, vector<2x8x32xf32>
    %cst = arith.constant dense<0.000000e+00> : vector<2x32xf32>
    %5 = vector.multi_reduction <add>, %4, %cst [1] : vector<2x8x32xf32> to vector<2x32xf32>
    %6 = arith.addf %3, %5 : vector<2x32xf32>
    %c0_5 = arith.constant 0 : index
    %c0_6 = arith.constant 0 : index
    %7 = vector.load %arg6[%c0_5, %c0_6] : memref<2x32xf32, #tpu.memory_space<vmem>>, vector<2x32xf32>
    tpu.vector_store %arg6[%c0_5, %c0_6], %6 {strides = array<i32>} : memref<2x32xf32, #tpu.memory_space<vmem>>, vector<2x32xf32>,
    %c0_i32_7 = arith.constant 0 : i32
    %8 = arith.cmpi eq, %arg1, %c0_i32_7 : i32
    %9 = arith.extui %8 : i1 to i32
    %c0_i32_8 = arith.constant 0 : i32
    %10 = arith.cmpi ne, %9, %c0_i32_8 : i32
    scf.if %10 {
      %c0_9 = arith.constant 0 : index
      %c0_10 = arith.constant 0 : index
      %11 = vector.load %arg6[%c0_9, %c0_10] : memref<2x32xf32, #tpu.memory_space<vmem>>, vector<2x32xf32>
      %cst_11 = arith.constant 1.250000e-01 : f32
      %12 = vector.broadcast %cst_11 : f32 to vector<2x32xf32>
      %13 = arith.mulf %11, %12 : vector<2x32xf32>
      %c0_12 = arith.constant 0 : index
      %c0_13 = arith.constant 0 : index
      %14 = vector.load %arg3[%c0_12, %c0_13] : memref<128x32xf32, #tpu.memory_space<vmem>>, vector<128x32xf32>
      %cst_14 = arith.constant dense<0.000000e+00> : vector<2x128xf32>
      %15 = tpu.matmul %13, %14, %cst_14 {dimension_numbers = #tpu.dot_dimension_numbers<[1], [1], [0], [0], [0, 0, 1, 0], [], []>} : vector<2x32xf32>, vector<128x32xf32>, vector<2x128xf32> -> vector<2x128xf32>
      %c0_15 = arith.constant 0 : index
      %c0_16 = arith.constant 0 : index
      %16 = vector.load %arg4[%c0_15, %c0_16] : memref<1x128xf32, #tpu.memory_space<vmem>>, vector<1x128xf32>
      %17 = vector.broadcast %16 : vector<1x128xf32> to vector<2x128xf32>
      %18 = arith.addf %15, %17 : vector<2x128xf32>
      %c0_17 = arith.constant 0 : index
      %c0_18 = arith.constant 0 : index
      %19 = vector.load %arg5[%c0_17, %c0_18] : memref<2x128xf32, #tpu.memory_space<vmem>>, vector<2x128xf32>
      tpu.vector_store %arg5[%c0_17, %c0_18], %18 {strides = array<i32>} : memref<2x128xf32, #tpu.memory_space<vmem>>, vector<2x128xf32>,
    } else {
    }
    return
  }
  func.func @transform_0(%arg0: i32, %arg1: i32) -> (i32, i32, i32) {
    %c0_i32 = arith.constant 0 : i32
    %c0_i32_0 = arith.constant 0 : i32
    return %arg0, %arg1, %c0_i32 : i32, i32, i32
  }
  func.func @transform_1(%arg0: i32, %arg1: i32) -> (i32, i32) {
    %c0_i32 = arith.constant 0 : i32
    %c0_i32_0 = arith.constant 0 : i32
    %c0_i32_1 = arith.constant 0 : i32
    return %c0_i32, %c0_i32_0 : i32, i32
  }
  func.func @transform_2(%arg0: i32, %arg1: i32) -> (i32, i32) {
    %c0_i32 = arith.constant 0 : i32
    %c0_i32_0 = arith.constant 0 : i32
    %c0_i32_1 = arith.constant 0 : i32
    return %c0_i32, %c0_i32_0 : i32, i32
  }
  func.func @transform_3(%arg0: i32, %arg1: i32) -> (i32, i32) {
    %c0_i32 = arith.constant 0 : i32
    %c0_i32_0 = arith.constant 0 : i32
    return %arg0, %c0_i32 : i32, i32
  }
}

</mosaic_0001>

<bundles_post_ra>
// kernel: _logits.1
= control target key start
LH: loop header
LB: loop body
LE: loop exit
PB: predicated region body
PF: predicated region fallthrough
CT: control target
= control target key end

     0   :  { %vm24_vm0 = vcmask 261120   ;;  %v306_v1 = vmov 0.0   ;;  %vm307_vm1 = vmmov 0   ;;  %vm19_vm2 = vcmask 254976   ;;  %s428_s0 = inlined_call_operand.vmem [shape: f32[2,8,32], index: 0, kind: input, shape index: {}]   ;;  %s429_s1 = inlined_call_operand.vmem [shape: f32[128,32], index: 1, kind: input, shape index: {}]   ;;  %s430_s2 = inlined_call_operand.vmem [shape: f32[1,128], index: 2, kind: input, shape index: {}]   ;;  %s431_s3 = inlined_call_operand.hbm [shape: f32[2,128], index: 3, kind: output, shape index: {}]  }
   0x1   :  { %v67_v0 = vld [vmem:[%s429_s1 + $0x78] sm:$0xff]  ;;  %246 = vmatprep.subr.mxu0 %v306_v1  ;;  %278 = vmatprep.mubr.msk.f32.mxu0 %vm307_vm1, %v306_v1  ;;  %20 = vst.msk [vmem:[#allocation2] sm:$0x3] %vm19_vm2, %v306_v1  ;;  %v66_v2 = vld [vmem:[%s429_s1 + $0x70] sm:$0xff]  ;;  %v22_v3 = vld [vmem:[%s428_s0] sm:$0xff] }
   0x2   :  { %247 = vmatpush3.xpose.msk.msra.mxu0 %vm24_vm0, %v67_v0  ;;  %v23_v4 = vld [vmem:[%s428_s0 + $0x8] sm:$0xff]  ;;  %v25_v5 = vsel %vm24_vm0, %v22_v3, 0.0 }
   0x3   :  { %248 = vmatprep.subr.mxu0 %v306_v1  ;;  %v32_v6 = vsel %vm24_vm0, %v23_v4, 0.0 }
   0x6   :  { %249 = vmatpush3.xpose.msk.msra.mxu0 %vm24_vm0, %v66_v2 }
   0x7   :  { %8 = vsyncpa [#allocation4], 0  ;;  %250 = vmatprep.subr.mxu0 %v306_v1  ;;  %v65_v7 = vld [vmem:[%s429_s1 + $0x68] sm:$0xff]  ;;  %v26_v8 = vrot.slane %v25_v5, 4  ;;  %v33_v9 = vrot.slane %v32_v6, 4  ;;  %v64_v12 = vld [vmem:[%s429_s1 + $0x60] sm:$0xff] }
   0x8   :  { %v63_v17 = vld [vmem:[%s429_s1 + $0x58] sm:$0xff]  ;;  %vm41_vm3 = vcmask 1041409   ;;  %v21_v20 = vld [vmem:[#allocation2] sm:$0x3]  ;;  %v62_v23 = vld [vmem:[%s429_s1 + $0x50] sm:$0xff]  ;;  %s308_s0 = smov [#allocation3]  }
   0x9   :  { %v27_v10 = vadd.f32 %v26_v8, %v25_v5  ;;  %v34_v11 = vadd.f32 %v33_v9, %v32_v6  ;;  %v61_v26 = vld [vmem:[%s429_s1 + $0x48] sm:$0xff]  ;;  %v60_v27 = vld [vmem:[%s429_s1 + $0x40] sm:$0xff]  ;;  %v59_v28 = vld [vmem:[%s429_s1 + $0x38] sm:$0xff]  ;;  %s203_s22 = sshll.u32 %s308_s0, 4  ;;  %s204_s22 = int_to_ptr.vmem [resolvable:$true] %s203_s22 }
   0xa   :  { %251 = vmatpush3.xpose.msk.msra.mxu0 %vm24_vm0, %v65_v7  ;;  %v58_v29 = vld [vmem:[%s429_s1 + $0x30] sm:$0xff]  ;;  %v57_v30 = vld [vmem:[%s429_s1 + $0x28] sm:$0xff]  ;;  %v56_v31 = vld [vmem:[%s429_s1 + $0x20] sm:$0xff]  ;;  %s284_s23 = scalar_lea.vmem %s204_s22, 32  ;;  %p289_p1 = scmp.lt.s32.totalorder %s204_s22, %s204_s22 }
   0xb   :  { %252 = vmatprep.subr.mxu0 %v306_v1  ;;  %v28_v13 = vrot.slane %v27_v10, 2  ;;  %v35_v14 = vrot.slane %v34_v11, 2  ;;  %v55_v32 = vld [vmem:[%s429_s1 + $0x18] sm:$0xff]  ;;  %v54_v33 = vld [vmem:[%s429_s1 + $0x10] sm:$0xff]  ;;  %v53_v34 = vld [vmem:[%s429_s1 + $0x8] sm:$0xff]  ;;  %p285_p0 = scmp.ne.s32.totalorder %s204_s22, %s284_s23  ;;  %p290_p2 = scmp.lt.s32.totalorder %s284_s23, %s284_s23 }
   0xc   :  { %v52_v36 = vld [vmem:[%s429_s1] sm:$0xff] }
   0xd   :  { %v29_v15 = vadd.f32 %v28_v13, %v27_v10  ;;  %v36_v16 = vadd.f32 %v35_v14, %v34_v11  ;;  %v211_v38 = vld [vmem:[%s430_s2] ss:$0 sm:$0xff]  ;;  %p291_p3 = por %p290_p2, %p289_p1 }
   0xe   :  { %253 = vmatpush3.xpose.msk.msra.mxu0 %vm24_vm0, %v64_v12 }
   0xf   :  { %254 = vmatprep.subr.mxu0 %v306_v1  ;;  %v30_v18 = vrot.slane %v29_v15, 1  ;;  %v37_v19 = vrot.slane %v36_v16, 1  ;;  %p292_p4 = pnand %p291_p3, %p285_p0 }
  0x11   :  { %v31_v21 = vadd.f32 %v30_v18, %v29_v15  ;;  %v38_v22 = vadd.f32 %v37_v19, %v36_v16 }
  0x12   :  { %255 = vmatpush3.xpose.msk.msra.mxu0 %vm24_vm0, %v63_v17 }
  0x13   :  { %256 = vmatprep.subr.mxu0 %v306_v1  ;;  %v42_v24 = vsel %vm41_vm3, %v38_v22, %v31_v21 }
  0x14   :  { %v44_v25 = vadd.f32 %v42_v24, %v21_v20 }
  0x16   :  { %257 = vmatpush3.xpose.msk.msra.mxu0 %vm24_vm0, %v62_v23  ;;  %46 = vst.msk [vmem:[#allocation2] sm:$0x3] %vm19_vm2, %v44_v25 }
  0x17   :  { %258 = vmatprep.subr.mxu0 %v306_v1 }
  0x1a   :  { %259 = vmatpush3.xpose.msk.msra.mxu0 %vm24_vm0, %v61_v26 }
  0x1b   :  { %260 = vmatprep.subr.mxu0 %v306_v1 }
  0x1d   :  { %v50_v35 = vld [vmem:[#allocation2] sm:$0x3] }
  0x1e   :  { %261 = vmatpush3.xpose.msk.msra.mxu0 %vm24_vm0, %v60_v27  ;;  %v51_v37 = vmul.f32 0.125, %v50_v35 }
  0x1f   :  { %262 = vmatprep.subr.mxu0 %v306_v1 }
  0x22   :  { %263 = vmatpush3.xpose.msk.msra.mxu0 %vm24_vm0, %v59_v28 }
  0x23   :  { %264 = vmatprep.subr.mxu0 %v306_v1 }
  0x26   :  { %265 = vmatpush3.xpose.msk.msra.mxu0 %vm24_vm0, %v58_v29 }
  0x27   :  { %266 = vmatprep.subr.mxu0 %v306_v1 }
  0x2a   :  { %267 = vmatpush3.xpose.msk.msra.mxu0 %vm24_vm0, %v57_v30 }
  0x2b   :  { %268 = vmatprep.subr.mxu0 %v306_v1 }
  0x2e   :  { %269 = vmatpush3.xpose.msk.msra.mxu0 %vm24_vm0, %v56_v31 }
  0x2f   :  { %270 = vmatprep.subr.mxu0 %v306_v1 }
  0x32   :  { %271 = vmatpush3.xpose.msk.msra.mxu0 %vm24_vm0, %v55_v32 }
  0x33   :  { %272 = vmatprep.subr.mxu0 %v306_v1 }
  0x36   :  { %273 = vmatpush3.xpose.msk.msra.mxu0 %vm24_vm0, %v54_v33 }
  0x37   :  { %274 = vmatprep.subr.mxu0 %v306_v1 }
  0x3a   :  { %275 = vmatpush3.xpose.msk.msra.mxu0 %vm24_vm0, %v53_v34 }
  0x3b   :  { %276 = vmatprep.subr.mxu0 %v306_v1 }
  0x3e   :  { %277 = vmatpush3.xpose.msk.msra.mxu0 %vm24_vm0, %v52_v36 }
  0x41   :  { %279 = vmatmul.mubr.msk.f32.vlgmr.msra.gmra.mxu0 %vm24_vm0, %v51_v37 }
 0x101   :  { %v192_v39 = vpop.f32.mrf.mxu0 }
 0x102   :  { %v193_v40 = vadd.f32 %v211_v38, %v192_v39 }
 0x103   :  { %v280_v41 = vpop.f32.mrf.mxu0 }
 0x104   :  { %196 = vst [vmem:[#allocation3] sm:$0x3] %v193_v40 }
 0x105   :  { %295 = shalt.err (!%p292_p4)
}
 0x106   :  { %206 = dma.vmem_to_hbm [thread:$0]  %s204_s22, 32, %s431_s3, [#allocation4]  }
 0x107   :  { %304 = dma.done.wait [#allocation4], 32  }
 0x108   :  { %305 = vsyncadd [#allocation4], 4294967264 }
 0x109   :  { %210 = vsyncpa [#allocation4], 1 }

</bundles_post_ra>
